<compile_context>
chip_gen: v6e
topology: v6e:2x2x1
jax: 0.10.0
libtpu: 0.0.40
codegen_flags: <defaults>
</compile_context>

<pallas_src>
import jax
import jax.numpy as jnp
from jax.experimental import pallas as pl
from jax.experimental.pallas import tpu as pltpu

N_POINT = 32           # LUT size, matches nn.Parameter(torch.linspace(0,1,32))
N_SPACE = N_POINT - 1  # 31 segments; segment index i is always in [0, 30]


def gamma_kernel(kpe_ref, x_ref, y_ref):
    # kpe_ref : SMEM (33,) f32  -- keypoints plus kp[31] repeated (pad entry
    #                              that can never be selected because i <= 30)
    # x_ref   : VMEM (br, w)    -- input tile (any float dtype)
    # y_ref   : VMEM (br, w)    -- output tile (caller's dtype)
    eps = 1e-6
    x = x_ref[...].astype(jnp.float32)

    xs = x * N_SPACE                                    # unclamped, for alpha
    xs_c = jnp.clip(xs, eps * N_SPACE, (1.0 - eps) * N_SPACE)
    i_f = jnp.floor(xs_c)                               # float index in [0, 30]
    alpha = xs - i_f                                    # fraction from UNCLAMPED x
    i = i_f.astype(jnp.int32)

    # Per-bit masks of i (LSB first), shared by every select below.
    b = [(i & (1 << t)) != 0 for t in range(5)]

    # Decompose i = 4*j + r  (j = i >> 2 in [0,7], r = i & 3 in [0,3]).
    # Both kp[i] and kp[i+1] live in {kp[4j + r'] : r' = 0..4}, so five
    # depth-3 select trees over j's bits (b[2..4]) fetch the candidates once,
    # shared by both lookups.
    def j_lookup(r):
        def rec(j0, nbits):
            if nbits == 0:
                return kpe_ref[4 * j0 + r]              # static scalar SMEM read
            half = 1 << (nbits - 1)
            lo = rec(j0, nbits - 1)
            hi = rec(j0 + half, nbits - 1)
            return jnp.where(b[2 + nbits - 1], hi, lo)
        return rec(0, 3)

    t = [j_lookup(r) for r in range(5)]                 # 5 x 7 = 35 vselects

    # Pick within the group of four using r's two bits (b[0], b[1]).
    def r_select(v0, v1, v2, v3):
        lo = jnp.where(b[0], v1, v0)
        hi = jnp.where(b[0], v3, v2)
        return jnp.where(b[1], hi, lo)

    base = r_select(t[0], t[1], t[2], t[3])             # kp[i]
    nxt = r_select(t[1], t[2], t[3], t[4])              # kp[i + 1]

    # TODO(synk): optional bf16 compute path for bf16 callers on v6e/v7x
    # (2x VALU throughput) -- omitted so the f32 1e-5 tolerance holds.
    y_ref[...] = (base + (nxt - base) * alpha).astype(y_ref.dtype)


def _round_up(a, b):
    return -(-a // b) * b


def _pick_block_rows(rows, max_block_rows):
    """Largest multiple-of-8 divisor of `rows` that is <= max_block_rows,
    preferring a choice that yields >= 2 grid programs (v7x megacore)."""
    m = rows // 8
    cap = max(1, max_block_rows // 8)
    best = 1
    for d in range(min(m, cap), 0, -1):
        if m % d == 0:
            best = d
            break
    if m // best == 1 and m >= 2:
        for d in range(m // 2, 0, -1):
            if m % d == 0:
                best = d
                break
    return best * 8


def gamma_pallas(x, keypoints, block_rows=256, lane_w=512):
    """Apply the Gamma LUT elementwise to x (any shape, any float dtype)."""
    orig_shape = x.shape
    orig_dtype = x.dtype
    flat = x.reshape(-1)
    n = flat.shape[0]

    # --- choose a lane-dense (rows, w) slab, avoiding padding when possible.
    w = None
    for cand in (lane_w, 1024, 512, 256, 128):
        if cand % 128 == 0 and n % cand == 0:
            w = cand
            break

    pad = 0
    if w is not None:
        rows = n // w
        if rows % 8 == 0:
            br = _pick_block_rows(rows, block_rows)
            if rows > 2 * block_rows and br < 64:
                w = None                 # awkward factorization: pad instead
        elif rows <= 512:
            br = rows                    # single block == full array (allowed)
        else:
            w = None                     # large ragged row count: pad instead

    if w is None:
        # Fallback: pad by at most one (br, lane_w) tile.  Costs one extra HBM
        # pass (jnp.pad + output slice); only taken when the element count is
        # not a multiple of 128 or factorizes badly.
        w = lane_w
        rows_exact = -(-n // w)
        br = min(block_rows, _round_up(rows_exact, 8))
        rows = _round_up(rows_exact, br)
        pad = rows * w - n
        flat = jnp.pad(flat, (0, pad))

    x2 = flat.reshape(rows, w)

    # Keypoints -> 33-entry SMEM table (kp plus a never-selected pad entry).
    kp = keypoints.astype(jnp.float32).reshape(-1)
    kpe = jnp.concatenate([kp, kp[-1:]])

    out = pl.pallas_call(
        gamma_kernel,
        out_shape=jax.ShapeDtypeStruct((rows, w), orig_dtype),
        grid=(rows // br,),
        in_specs=[
            pl.BlockSpec(memory_space=pltpu.MemorySpace.SMEM),   # kpe table
            pl.BlockSpec((br, w), lambda r: (r, 0)),             # x tile
        ],
        out_specs=pl.BlockSpec((br, w), lambda r: (r, 0)),
        compiler_params=pltpu.CompilerParams(
            dimension_semantics=("parallel",)),
    )(kpe, x2)

    if pad:
        out = out.reshape(-1)[:n]
    return out.reshape(orig_shape).astype(orig_dtype)


def gamma_ref(x, keypoints):
    """Pure-JAX reference matching the PyTorch forward exactly."""
    eps = 1e-6
    xf = x.astype(jnp.float32)
    kp = keypoints.astype(jnp.float32)
    x_c = jnp.clip(xf, eps, 1.0 - eps)
    i = jnp.floor(x_c * N_SPACE).astype(jnp.int32)
    alpha = xf * N_SPACE - i.astype(jnp.float32)
    return kp[i] * (1.0 - alpha) + kp[i + 1] * alpha


if __name__ == "__main__":
    # Deterministic parameter init, same as nn.Parameter(torch.linspace(0,1,32)).
    keypoints = jnp.linspace(0.0, 1.0, N_POINT, dtype=jnp.float32)

    key = jax.random.PRNGKey(0)
    x = jax.random.uniform(key, (2, 4, 16, 16), dtype=jnp.float32)  # NCHW

    y = gamma_pallas(x, keypoints)
    y = jax.block_until_ready(y)

    y_ref = gamma_ref(x, keypoints)
    assert y.shape == x.shape and y.dtype == x.dtype
    assert jnp.allclose(y, y_ref, atol=1e-5, rtol=1e-5), (
        float(jnp.max(jnp.abs(y - y_ref))))

    print("KERNEL_OK")
</pallas_src>

<mosaic_0001>
module attributes {stable_mosaic.version = 11 : i64} {
  func.func @gamma_kernel(%arg0: i32, %arg1: memref<33xf32, #tpu.memory_space<smem>>, %arg2: memref<4x512xf32, #tpu.memory_space<vmem>>, %arg3: memref<4x512xf32, #tpu.memory_space<vmem>>) attributes {dimension_semantics = [#tpu.dimension_semantics<parallel>], iteration_bounds = array<i64: 1>, scalar_prefetch = 0 : i64, scratch_operands = 0 : i64, tpu.core_type = #tpu.core_type<tc>, window_params = [{transform_indices = @transform_0, window_bounds = array<i64: 33>}, {transform_indices = @transform_1, window_bounds = array<i64: 4, 512>}, {transform_indices = @transform_2, window_bounds = array<i64: 4, 512>}]} {
    %c0 = arith.constant 0 : index
    %c0_0 = arith.constant 0 : index
    %0 = vector.load %arg2[%c0, %c0_0] : memref<4x512xf32, #tpu.memory_space<vmem>>, vector<4x512xf32>
    %cst = arith.constant 3.100000e+01 : f32
    %1 = vector.broadcast %cst : f32 to vector<4x512xf32>
    %2 = arith.mulf %0, %1 : vector<4x512xf32>
    %cst_1 = arith.constant 3.100000e-05 : f32
    %cst_2 = arith.constant 30.9999695 : f32
    %3 = vector.broadcast %cst_1 : f32 to vector<4x512xf32>
    %4 = arith.maximumf %3, %2 : vector<4x512xf32>
    %5 = vector.broadcast %cst_2 : f32 to vector<4x512xf32>
    %6 = arith.minimumf %5, %4 : vector<4x512xf32>
    %7 = math.floor %6 : vector<4x512xf32>
    %8 = arith.subf %2, %7 : vector<4x512xf32>
    %9 = arith.fptosi %7 : vector<4x512xf32> to vector<4x512xi32>
    %c1_i32 = arith.constant 1 : i32
    %10 = vector.broadcast %c1_i32 : i32 to vector<4x512xi32>
    %11 = arith.andi %9, %10 : vector<4x512xi32>
    %c0_i32 = arith.constant 0 : i32
    %12 = vector.broadcast %c0_i32 : i32 to vector<4x512xi32>
    %13 = arith.cmpi ne, %11, %12 : vector<4x512xi32>
    %c2_i32 = arith.constant 2 : i32
    %14 = vector.broadcast %c2_i32 : i32 to vector<4x512xi32>
    %15 = arith.andi %9, %14 : vector<4x512xi32>
    %c0_i32_3 = arith.constant 0 : i32
    %16 = vector.broadcast %c0_i32_3 : i32 to vector<4x512xi32>
    %17 = arith.cmpi ne, %15, %16 : vector<4x512xi32>
    %c4_i32 = arith.constant 4 : i32
    %18 = vector.broadcast %c4_i32 : i32 to vector<4x512xi32>
    %19 = arith.andi %9, %18 : vector<4x512xi32>
    %c0_i32_4 = arith.constant 0 : i32
    %20 = vector.broadcast %c0_i32_4 : i32 to vector<4x512xi32>
    %21 = arith.cmpi ne, %19, %20 : vector<4x512xi32>
    %c8_i32 = arith.constant 8 : i32
    %22 = vector.broadcast %c8_i32 : i32 to vector<4x512xi32>
    %23 = arith.andi %9, %22 : vector<4x512xi32>
    %c0_i32_5 = arith.constant 0 : i32
    %24 = vector.broadcast %c0_i32_5 : i32 to vector<4x512xi32>
    %25 = arith.cmpi ne, %23, %24 : vector<4x512xi32>
    %c16_i32 = arith.constant 16 : i32
    %26 = vector.broadcast %c16_i32 : i32 to vector<4x512xi32>
    %27 = arith.andi %9, %26 : vector<4x512xi32>
    %c0_i32_6 = arith.constant 0 : i32
    %28 = vector.broadcast %c0_i32_6 : i32 to vector<4x512xi32>
    %29 = arith.cmpi ne, %27, %28 : vector<4x512xi32>
    %c0_7 = arith.constant 0 : index
    %30 = memref.load %arg1[%c0_7] : memref<33xf32, #tpu.memory_space<smem>>
    %c4 = arith.constant 4 : index
    %31 = memref.load %arg1[%c4] : memref<33xf32, #tpu.memory_space<smem>>
    %32 = vector.broadcast %31 : f32 to vector<4x512xf32>
    %33 = vector.broadcast %30 : f32 to vector<4x512xf32>
    %34 = arith.select %21, %32, %33 : vector<4x512xi1>, vector<4x512xf32>
    %c8 = arith.constant 8 : index
    %35 = memref.load %arg1[%c8] : memref<33xf32, #tpu.memory_space<smem>>
    %c12 = arith.constant 12 : index
    %36 = memref.load %arg1[%c12] : memref<33xf32, #tpu.memory_space<smem>>
    %37 = vector.broadcast %36 : f32 to vector<4x512xf32>
    %38 = vector.broadcast %35 : f32 to vector<4x512xf32>
    %39 = arith.select %21, %37, %38 : vector<4x512xi1>, vector<4x512xf32>
    %40 = arith.select %25, %39, %34 : vector<4x512xi1>, vector<4x512xf32>
    %c16 = arith.constant 16 : index
    %41 = memref.load %arg1[%c16] : memref<33xf32, #tpu.memory_space<smem>>
    %c20 = arith.constant 20 : index
    %42 = memref.load %arg1[%c20] : memref<33xf32, #tpu.memory_space<smem>>
    %43 = vector.broadcast %42 : f32 to vector<4x512xf32>
    %44 = vector.broadcast %41 : f32 to vector<4x512xf32>
    %45 = arith.select %21, %43, %44 : vector<4x512xi1>, vector<4x512xf32>
    %c24 = arith.constant 24 : index
    %46 = memref.load %arg1[%c24] : memref<33xf32, #tpu.memory_space<smem>>
    %c28 = arith.constant 28 : index
    %47 = memref.load %arg1[%c28] : memref<33xf32, #tpu.memory_space<smem>>
    %48 = vector.broadcast %47 : f32 to vector<4x512xf32>
    %49 = vector.broadcast %46 : f32 to vector<4x512xf32>
    %50 = arith.select %21, %48, %49 : vector<4x512xi1>, vector<4x512xf32>
    %51 = arith.select %25, %50, %45 : vector<4x512xi1>, vector<4x512xf32>
    %52 = arith.select %29, %51, %40 : vector<4x512xi1>, vector<4x512xf32>
    %c1 = arith.constant 1 : index
    %53 = memref.load %arg1[%c1] : memref<33xf32, #tpu.memory_space<smem>>
    %c5 = arith.constant 5 : index
    %54 = memref.load %arg1[%c5] : memref<33xf32, #tpu.memory_space<smem>>
    %55 = vector.broadcast %54 : f32 to vector<4x512xf32>
    %56 = vector.broadcast %53 : f32 to vector<4x512xf32>
    %57 = arith.select %21, %55, %56 : vector<4x512xi1>, vector<4x512xf32>
    %c9 = arith.constant 9 : index
    %58 = memref.load %arg1[%c9] : memref<33xf32, #tpu.memory_space<smem>>
    %c13 = arith.constant 13 : index
    %59 = memref.load %arg1[%c13] : memref<33xf32, #tpu.memory_space<smem>>
    %60 = vector.broadcast %59 : f32 to vector<4x512xf32>
    %61 = vector.broadcast %58 : f32 to vector<4x512xf32>
    %62 = arith.select %21, %60, %61 : vector<4x512xi1>, vector<4x512xf32>
    %63 = arith.select %25, %62, %57 : vector<4x512xi1>, vector<4x512xf32>
    %c17 = arith.constant 17 : index
    %64 = memref.load %arg1[%c17] : memref<33xf32, #tpu.memory_space<smem>>
    %c21 = arith.constant 21 : index
    %65 = memref.load %arg1[%c21] : memref<33xf32, #tpu.memory_space<smem>>
    %66 = vector.broadcast %65 : f32 to vector<4x512xf32>
    %67 = vector.broadcast %64 : f32 to vector<4x512xf32>
    %68 = arith.select %21, %66, %67 : vector<4x512xi1>, vector<4x512xf32>
    %c25 = arith.constant 25 : index
    %69 = memref.load %arg1[%c25] : memref<33xf32, #tpu.memory_space<smem>>
    %c29 = arith.constant 29 : index
    %70 = memref.load %arg1[%c29] : memref<33xf32, #tpu.memory_space<smem>>
    %71 = vector.broadcast %70 : f32 to vector<4x512xf32>
    %72 = vector.broadcast %69 : f32 to vector<4x512xf32>
    %73 = arith.select %21, %71, %72 : vector<4x512xi1>, vector<4x512xf32>
    %74 = arith.select %25, %73, %68 : vector<4x512xi1>, vector<4x512xf32>
    %75 = arith.select %29, %74, %63 : vector<4x512xi1>, vector<4x512xf32>
    %c2 = arith.constant 2 : index
    %76 = memref.load %arg1[%c2] : memref<33xf32, #tpu.memory_space<smem>>
    %c6 = arith.constant 6 : index
    %77 = memref.load %arg1[%c6] : memref<33xf32, #tpu.memory_space<smem>>
    %78 = vector.broadcast %77 : f32 to vector<4x512xf32>
    %79 = vector.broadcast %76 : f32 to vector<4x512xf32>
    %80 = arith.select %21, %78, %79 : vector<4x512xi1>, vector<4x512xf32>
    %c10 = arith.constant 10 : index
    %81 = memref.load %arg1[%c10] : memref<33xf32, #tpu.memory_space<smem>>
    %c14 = arith.constant 14 : index
    %82 = memref.load %arg1[%c14] : memref<33xf32, #tpu.memory_space<smem>>
    %83 = vector.broadcast %82 : f32 to vector<4x512xf32>
    %84 = vector.broadcast %81 : f32 to vector<4x512xf32>
    %85 = arith.select %21, %83, %84 : vector<4x512xi1>, vector<4x512xf32>
    %86 = arith.select %25, %85, %80 : vector<4x512xi1>, vector<4x512xf32>
    %c18 = arith.constant 18 : index
    %87 = memref.load %arg1[%c18] : memref<33xf32, #tpu.memory_space<smem>>
    %c22 = arith.constant 22 : index
    %88 = memref.load %arg1[%c22] : memref<33xf32, #tpu.memory_space<smem>>
    %89 = vector.broadcast %88 : f32 to vector<4x512xf32>
    %90 = vector.broadcast %87 : f32 to vector<4x512xf32>
    %91 = arith.select %21, %89, %90 : vector<4x512xi1>, vector<4x512xf32>
    %c26 = arith.constant 26 : index
    %92 = memref.load %arg1[%c26] : memref<33xf32, #tpu.memory_space<smem>>
    %c30 = arith.constant 30 : index
    %93 = memref.load %arg1[%c30] : memref<33xf32, #tpu.memory_space<smem>>
    %94 = vector.broadcast %93 : f32 to vector<4x512xf32>
    %95 = vector.broadcast %92 : f32 to vector<4x512xf32>
    %96 = arith.select %21, %94, %95 : vector<4x512xi1>, vector<4x512xf32>
    %97 = arith.select %25, %96, %91 : vector<4x512xi1>, vector<4x512xf32>
    %98 = arith.select %29, %97, %86 : vector<4x512xi1>, vector<4x512xf32>
    %c3 = arith.constant 3 : index
    %99 = memref.load %arg1[%c3] : memref<33xf32, #tpu.memory_space<smem>>
    %c7 = arith.constant 7 : index
    %100 = memref.load %arg1[%c7] : memref<33xf32, #tpu.memory_space<smem>>
    %101 = vector.broadcast %100 : f32 to vector<4x512xf32>
    %102 = vector.broadcast %99 : f32 to vector<4x512xf32>
    %103 = arith.select %21, %101, %102 : vector<4x512xi1>, vector<4x512xf32>
    %c11 = arith.constant 11 : index
    %104 = memref.load %arg1[%c11] : memref<33xf32, #tpu.memory_space<smem>>
    %c15 = arith.constant 15 : index
    %105 = memref.load %arg1[%c15] : memref<33xf32, #tpu.memory_space<smem>>
    %106 = vector.broadcast %105 : f32 to vector<4x512xf32>
    %107 = vector.broadcast %104 : f32 to vector<4x512xf32>
    %108 = arith.select %21, %106, %107 : vector<4x512xi1>, vector<4x512xf32>
    %109 = arith.select %25, %108, %103 : vector<4x512xi1>, vector<4x512xf32>
    %c19 = arith.constant 19 : index
    %110 = memref.load %arg1[%c19] : memref<33xf32, #tpu.memory_space<smem>>
    %c23 = arith.constant 23 : index
    %111 = memref.load %arg1[%c23] : memref<33xf32, #tpu.memory_space<smem>>
    %112 = vector.broadcast %111 : f32 to vector<4x512xf32>
    %113 = vector.broadcast %110 : f32 to vector<4x512xf32>
    %114 = arith.select %21, %112, %113 : vector<4x512xi1>, vector<4x512xf32>
    %c27 = arith.constant 27 : index
    %115 = memref.load %arg1[%c27] : memref<33xf32, #tpu.memory_space<smem>>
    %c31 = arith.constant 31 : index
    %116 = memref.load %arg1[%c31] : memref<33xf32, #tpu.memory_space<smem>>
    %117 = vector.broadcast %116 : f32 to vector<4x512xf32>
    %118 = vector.broadcast %115 : f32 to vector<4x512xf32>
    %119 = arith.select %21, %117, %118 : vector<4x512xi1>, vector<4x512xf32>
    %120 = arith.select %25, %119, %114 : vector<4x512xi1>, vector<4x512xf32>
    %121 = arith.select %29, %120, %109 : vector<4x512xi1>, vector<4x512xf32>
    %c4_8 = arith.constant 4 : index
    %122 = memref.load %arg1[%c4_8] : memref<33xf32, #tpu.memory_space<smem>>
    %c8_9 = arith.constant 8 : index
    %123 = memref.load %arg1[%c8_9] : memref<33xf32, #tpu.memory_space<smem>>
    %124 = vector.broadcast %123 : f32 to vector<4x512xf32>
    %125 = vector.broadcast %122 : f32 to vector<4x512xf32>
    %126 = arith.select %21, %124, %125 : vector<4x512xi1>, vector<4x512xf32>
    %c12_10 = arith.constant 12 : index
    %127 = memref.load %arg1[%c12_10] : memref<33xf32, #tpu.memory_space<smem>>
    %c16_11 = arith.constant 16 : index
    %128 = memref.load %arg1[%c16_11] : memref<33xf32, #tpu.memory_space<smem>>
    %129 = vector.broadcast %128 : f32 to vector<4x512xf32>
    %130 = vector.broadcast %127 : f32 to vector<4x512xf32>
    %131 = arith.select %21, %129, %130 : vector<4x512xi1>, vector<4x512xf32>
    %132 = arith.select %25, %131, %126 : vector<4x512xi1>, vector<4x512xf32>
    %c20_12 = arith.constant 20 : index
    %133 = memref.load %arg1[%c20_12] : memref<33xf32, #tpu.memory_space<smem>>
    %c24_13 = arith.constant 24 : index
    %134 = memref.load %arg1[%c24_13] : memref<33xf32, #tpu.memory_space<smem>>
    %135 = vector.broadcast %134 : f32 to vector<4x512xf32>
    %136 = vector.broadcast %133 : f32 to vector<4x512xf32>
    %137 = arith.select %21, %135, %136 : vector<4x512xi1>, vector<4x512xf32>
    %c28_14 = arith.constant 28 : index
    %138 = memref.load %arg1[%c28_14] : memref<33xf32, #tpu.memory_space<smem>>
    %c32 = arith.constant 32 : index
    %139 = memref.load %arg1[%c32] : memref<33xf32, #tpu.memory_space<smem>>
    %140 = vector.broadcast %139 : f32 to vector<4x512xf32>
    %141 = vector.broadcast %138 : f32 to vector<4x512xf32>
    %142 = arith.select %21, %140, %141 : vector<4x512xi1>, vector<4x512xf32>
    %143 = arith.select %25, %142, %137 : vector<4x512xi1>, vector<4x512xf32>
    %144 = arith.select %29, %143, %132 : vector<4x512xi1>, vector<4x512xf32>
    %145 = arith.select %13, %75, %52 : vector<4x512xi1>, vector<4x512xf32>
    %146 = arith.select %13, %121, %98 : vector<4x512xi1>, vector<4x512xf32>
    %147 = arith.select %17, %146, %145 : vector<4x512xi1>, vector<4x512xf32>
    %148 = arith.select %13, %98, %75 : vector<4x512xi1>, vector<4x512xf32>
    %149 = arith.select %13, %144, %121 : vector<4x512xi1>, vector<4x512xf32>
    %150 = arith.select %17, %149, %148 : vector<4x512xi1>, vector<4x512xf32>
    %151 = arith.subf %150, %147 : vector<4x512xf32>
    %152 = arith.mulf %151, %8 : vector<4x512xf32>
    %153 = arith.addf %147, %152 : vector<4x512xf32>
    %c0_15 = arith.constant 0 : index
    %c0_16 = arith.constant 0 : index
    %154 = vector.load %arg3[%c0_15, %c0_16] : memref<4x512xf32, #tpu.memory_space<vmem>>, vector<4x512xf32>
    tpu.vector_store %arg3[%c0_15, %c0_16], %153 {strides = array<i32>} : memref<4x512xf32, #tpu.memory_space<vmem>>, vector<4x512xf32>,
    return
  }
  func.func @transform_0(%arg0: i32) -> i32 {
    %c0_i32 = arith.constant 0 : i32
    %c0_i32_0 = arith.constant 0 : i32
    return %c0_i32 : i32
  }
  func.func @transform_1(%arg0: i32) -> (i32, i32) {
    %c0_i32 = arith.constant 0 : i32
    %c0_i32_0 = arith.constant 0 : i32
    return %arg0, %c0_i32 : i32, i32
  }
  func.func @transform_2(%arg0: i32) -> (i32, i32) {
    %c0_i32 = arith.constant 0 : i32
    %c0_i32_0 = arith.constant 0 : i32
    return %arg0, %c0_i32 : i32, i32
  }
}

</mosaic_0001>

<bundles_post_ra>
// kernel: tpu_custom_call.1
= control target key start
LH: loop header
LB: loop body
LE: loop exit
PB: predicated region body
PF: predicated region fallthrough
CT: control target
= control target key end

     0   :  { %7 = vsyncpa [#allocation5], 0  ;;  %s759_s0 = inlined_call_operand.hbm [shape: f32[33], index: 0, kind: input, shape index: {}]   ;;  %s760_s1 = inlined_call_operand.hbm [shape: f32[4,512], index: 1, kind: input, shape index: {}]   ;;  %s761_s2 = inlined_call_operand.hbm [shape: f32[4,512], index: 2, kind: output, shape index: {}]  }
   0x1   :  { %8 = vsyncpa [#allocation3], 0 }
   0x2   :  { %9 = vsyncpa [#allocation4], 0  ;;  %s334_s9 = smov [#allocation2]   ;;  %s335_s12 = smov [#allocation6]  }
   0x3   :  { %17 = dma.hbm_to_smem %s759_s0, 16, %s334_s9, [#allocation5]  }
   0x4   :  { %s24_s13 = sshll.u32 %s335_s12, 4  ;;  %s25_s13 = int_to_ptr.vmem [resolvable:$true] %s24_s13 }
   0x5   :  { %s296_s14 = scalar_lea.vmem %s25_s13, 256  ;;  %p301_p1 = scmp.lt.s32.totalorder %s25_s13, %s25_s13 }
   0x6   :  { %p297_p0 = scmp.ne.s32.totalorder %s25_s13, %s296_s14  ;;  %p302_p2 = scmp.lt.s32.totalorder %s296_s14, %s296_s14 }
   0x8   :  { %p303_p3 = por %p302_p2, %p301_p1 }
   0xa   :  { %p304_p4 = pnand %p303_p3, %p297_p0 }
   0xc   :  { %307 = shalt.err (!%p304_p4)
}
   0xd   :  { %27 = dma.hbm_to_vmem [thread:$0]  %s760_s1, 256, %s25_s13, [#allocation3]  }
   0xe   :  { %328 = dma.done.wait [#allocation5], 16  }
   0xf   :  { %329 = vsyncadd [#allocation5], 4294967280 }
  0x10   :  { %330 = dma.done.wait [#allocation3], 256  }
  0x11   :  { %331 = vsyncadd [#allocation3], 4294967040 }
  0x12   :  { %34 = sfence }
  0x13   :  { %v35_v0 = vld [vmem:[#allocation6] sm:$0xff]  ;;  %v36_v1 = vld [vmem:[#allocation6 + $0x8] sm:$0xff]  ;;  %s358_s0 = sld [smem:[#allocation2]] }
  0x14   :  { %v360_v2 = vmul.f32 31.0, %v35_v0  ;;  %v362_v3 = vmul.f32 31.0, %v36_v1  ;;  %s241_s17 = sld [smem:[#allocation2 + $0x4]] }
  0x15   :  { %s242_s18 = sld [smem:[#allocation2 + $0x8]] }
  0x16   :  { %v39_v4 = vmax.f32 %v360_v2, 3.1e-05  ;;  %v40_v5 = vmax.f32 %v362_v3, 3.1e-05  ;;  %s243_s1 = sld [smem:[#allocation2 + $0xc]] }
  0x17   :  { %s244_s19 = sld [smem:[#allocation2 + $0x10]] }
  0x18   :  { %v366_v6 = vmin.f32 %v39_v4, 30.99997  ;;  %v368_v7 = vmin.f32 %v40_v5, 30.99997  ;;  %s245_s20 = sld [smem:[#allocation2 + $0x14]] }
  0x19   :  { %s246_s21 = sld [smem:[#allocation2 + $0x18]]  ;;  %v72_v15 = vstv %s358_s0 }
  0x1a   :  { %v43_v8 = vfloor.f32 %v366_v6  ;;  %v44_v9 = vfloor.f32 %v368_v7  ;;  %s372_s22 = sld [smem:[#allocation2 + $0x1c]]  ;;  %v390_v14 = vstv %s241_s17 }
  0x1b   :  { %s374_s23 = sld [smem:[#allocation2 + $0x1]]  ;;  %v393_v16 = vstv %s242_s18 }
  0x1c   :  { %v273_v10 = vtrunc.f32 %v43_v8  ;;  %v275_v11 = vtrunc.f32 %v44_v9  ;;  %s380_s24 = sld [smem:[#allocation2 + $0x5]]  ;;  %v397_v17 = vstv %s243_s1  ;;  %s336_s1 = smov [#allocation7]  }
  0x1d   :  { %s382_s25 = sld [smem:[#allocation2 + $0x9]]  ;;  %v401_v19 = vstv %s244_s19  ;;  %s231_s19 = sshll.u32 %s336_s1, 4  ;;  %s232_s19 = int_to_ptr.vmem [resolvable:$true] %s231_s19 }
  0x1e   :  { %v384_v12 = vcvt.f32.s32 %v273_v10  ;;  %v386_v13 = vcvt.f32.s32 %v275_v11  ;;  %s388_s26 = sld [smem:[#allocation2 + $0xd]]  ;;  %v399_v18 = vstv %s245_s20  ;;  %s308_s20 = scalar_lea.vmem %s232_s19, 256 }
  0x1f   :  { %s395_s27 = sld [smem:[#allocation2 + $0x11]]  ;;  %v403_v20 = vstv %s246_s21  ;;  %p309_p5 = scmp.ne.s32.totalorder %s232_s19, %s308_s20 }
  0x20   :  { %s405_s28 = sld [smem:[#allocation2 + $0x15]]  ;;  %v57_v21 = vand.u32 4, %v384_v12  ;;  %v58_v22 = vand.u32 4, %v386_v13  ;;  %v61_v23 = vand.u32 8, %v384_v12  ;;  %v62_v24 = vand.u32 8, %v386_v13  ;;  %p313_p6 = scmp.lt.s32.totalorder %s232_s19, %s232_s19 }
  0x21   :  { %s411_s29 = sld [smem:[#allocation2 + $0x19]]  ;;  %v49_v25 = vand.u32 1, %v384_v12  ;;  %v50_v26 = vand.u32 1, %v386_v13  ;;  %v53_v27 = vand.u32 2, %v384_v12  ;;  %v54_v28 = vand.u32 2, %v386_v13  ;;  %p314_p7 = scmp.lt.s32.totalorder %s308_s20, %s308_s20 }
  0x22   :  { %s417_s30 = sld [smem:[#allocation2 + $0x1d]]  ;;  %vm419_vm0 = vcmp.ne.s32.totalorder %v57_v21, 0  ;;  %vm423_vm1 = vcmp.ne.s32.totalorder %v58_v22, 0  ;;  %vm427_vm2 = vcmp.ne.s32.totalorder %v61_v23, 0  ;;  %vm431_vm3 = vcmp.ne.s32.totalorder %v62_v24, 0 }
  0x23   :  { %s435_s3 = sld [smem:[#allocation2 + $0x2]]  ;;  %v65_v33 = vand.u32 16, %v384_v12  ;;  %v66_v34 = vand.u32 16, %v386_v13  ;;  %v73_v35 = vsel %vm419_vm0, %v390_v14, %v72_v15  ;;  %v74_v36 = vsel %vm423_vm1, %v390_v14, %v72_v15  ;;  %p315_p8 = por %p314_p7, %p313_p6 }
  0x24   :  { %s445_s4 = sld [smem:[#allocation2 + $0x6]]  ;;  %v79_v37 = vsel %vm419_vm0, %v397_v17, %v393_v16  ;;  %v80_v38 = vsel %vm423_vm1, %v397_v17, %v393_v16  ;;  %v87_v39 = vsel %vm419_vm0, %v399_v18, %v401_v19  ;;  %v88_v40 = vsel %vm423_vm1, %v399_v18, %v401_v19 }
  0x25   :  { %s463_s5 = sld [smem:[#allocation2 + $0xa]]  ;;  %vm465_vm4 = vcmp.ne.s32.totalorder %v65_v33, 0  ;;  %vm469_vm5 = vcmp.ne.s32.totalorder %v66_v34, 0  ;;  %v475_v43 = vsel %vm427_vm2, %v79_v37, %v73_v35  ;;  %v479_v44 = vsel %vm431_vm3, %v80_v38, %v74_v36  ;;  %p316_p9 = pnand %p315_p8, %p309_p5 }
  0x26   :  { %s481_s6 = sld [smem:[#allocation2 + $0xe]]  ;;  %v484_v45 = vstv %s372_s22  ;;  %v101_v46 = vstv %s380_s24  ;;  %v102_v47 = vstv %s374_s23  ;;  %v107_v48 = vstv %s388_s26 }
  0x27   :  { %s489_s7 = sld [smem:[#allocation2 + $0x12]]  ;;  %v93_v49 = vsel %vm419_vm0, %v484_v45, %v403_v20  ;;  %v94_v50 = vsel %vm423_vm1, %v484_v45, %v403_v20  ;;  %v103_v51 = vsel %vm419_vm0, %v101_v46, %v102_v47  ;;  %v104_v52 = vsel %vm423_vm1, %v101_v46, %v102_v47 }
  0x28   :  { %s503_s8 = sld [smem:[#allocation2 + $0x16]]  ;;  %v507_v53 = vsel %vm427_vm2, %v93_v49, %v87_v39  ;;  %v511_v54 = vsel %vm431_vm3, %v94_v50, %v88_v40  ;;  %v108_v55 = vstv %s382_s25  ;;  %v115_v56 = vstv %s405_s28 }
  0x29   :  { %s515_s9 = sld [smem:[#allocation2 + $0x1a]]  ;;  %v97_v57 = vsel %vm465_vm4, %v507_v53, %v475_v43  ;;  %v98_v58 = vsel %vm469_vm5, %v511_v54, %v479_v44  ;;  %v109_v59 = vsel %vm419_vm0, %v107_v48, %v108_v55  ;;  %v110_v60 = vsel %vm423_vm1, %v107_v48, %v108_v55 }
  0x2a   :  { %s529_s10 = sld [smem:[#allocation2 + $0x1e]]  ;;  %v111_v61 = vsel %vm427_vm2, %v109_v59, %v103_v51  ;;  %v112_v62 = vsel %vm431_vm3, %v110_v60, %v104_v52  ;;  %v116_v63 = vstv %s395_s27  ;;  %v121_v0 = vstv %s417_s30 }
  0x2b   :  { %s537_s11 = sld [smem:[#allocation2 + $0x3]]  ;;  %v117_v1 = vsel %vm419_vm0, %v115_v56, %v116_v63  ;;  %v118_v4 = vsel %vm423_vm1, %v115_v56, %v116_v63  ;;  %v122_v5 = vstv %s411_s29  ;;  %v131_v10 = vstv %s445_s4 }
  0x2c   :  { %s545_s12 = sld [smem:[#allocation2 + $0x7]]  ;;  %v123_v11 = vsel %vm419_vm0, %v121_v0, %v122_v5  ;;  %v124_v15 = vsel %vm423_vm1, %v121_v0, %v122_v5  ;;  %v132_v21 = vstv %s435_s3  ;;  %v137_v22 = vstv %s481_s6 }
  0x2d   :  { %s553_s13 = sld [smem:[#allocation2 + $0xb]]  ;;  %v125_v23 = vsel %vm427_vm2, %v123_v11, %v117_v1  ;;  %v126_v24 = vsel %vm431_vm3, %v124_v15, %v118_v4  ;;  %v133_v33 = vsel %vm419_vm0, %v131_v10, %v132_v21  ;;  %v134_v34 = vsel %vm423_vm1, %v131_v10, %v132_v21 }
  0x2e   :  { %s563_s14 = sld [smem:[#allocation2 + $0xf]]  ;;  %v567_v35 = vsel %vm465_vm4, %v125_v23, %v111_v61  ;;  %v571_v36 = vsel %vm469_vm5, %v126_v24, %v112_v62  ;;  %v138_v37 = vstv %s463_s5  ;;  %v145_v38 = vstv %s503_s8 }
  0x2f   :  { %s575_s15 = sld [smem:[#allocation2 + $0x13]]  ;;  %v139_v39 = vsel %vm419_vm0, %v137_v22, %v138_v37  ;;  %v140_v40 = vsel %vm423_vm1, %v137_v22, %v138_v37  ;;  %v146_v46 = vstv %s489_s7  ;;  %vm587_vm6 = vcmp.ne.s32.totalorder %v49_v25, 0 }
  0x30   :  { %v151_v47 = vstv %s529_s10  ;;  %s583_s16 = sld [smem:[#allocation2 + $0x17]]  ;;  %vm593_vm7 = vcmp.ne.s32.totalorder %v50_v26, 0  ;;  %v141_v50 = vsel %vm427_vm2, %v139_v39, %v133_v33  ;;  %v142_v51 = vsel %vm431_vm3, %v140_v40, %v134_v34 }
  0x31   :  { %v147_v52 = vsel %vm419_vm0, %v145_v38, %v146_v46  ;;  %v148_v25 = vsel %vm423_vm1, %v145_v38, %v146_v46  ;;  %s605_s0 = sld [smem:[#allocation2 + $0x1b]]  ;;  %v152_v26 = vstv %s515_s9  ;;  %v162_v56 = vstv %s537_s11 }
  0x32   :  { %v161_v55 = vstv %s545_s12  ;;  %s271_s17 = sld [smem:[#allocation2 + $0x1f]]  ;;  %v189_v59 = vsel %vm419_vm0, %v393_v16, %v390_v14  ;;  %vm616_vm8 = vcmp.ne.s32.totalorder %v53_v27, 0  ;;  %vm622_vm9 = vcmp.ne.s32.totalorder %v54_v28, 0 }
  0x33   :  { %v153_v62 = vsel %vm419_vm0, %v151_v47, %v152_v26  ;;  %v154_v63 = vsel %vm423_vm1, %v151_v47, %v152_v26  ;;  %v163_v12 = vsel %vm419_vm0, %v161_v55, %v162_v56  ;;  %v164_v27 = vsel %vm423_vm1, %v161_v55, %v162_v56  ;;  %s634_s18 = sld [smem:[#allocation2 + $0x20]] }
  0x34   :  { %v155_v13 = vsel %vm427_vm2, %v153_v62, %v147_v52  ;;  %v156_v28 = vsel %vm431_vm3, %v154_v63, %v148_v25  ;;  %v167_v0 = vstv %s563_s14  ;;  %v168_v1 = vstv %s553_s13 }
  0x35   :  { %v157_v4 = vsel %vm465_vm4, %v155_v13, %v141_v50  ;;  %v158_v5 = vsel %vm469_vm5, %v156_v28, %v142_v51  ;;  %v169_v10 = vsel %vm419_vm0, %v167_v0, %v168_v1  ;;  %v170_v11 = vsel %vm423_vm1, %v167_v0, %v168_v1 }
  0x36   :  { %v171_v15 = vsel %vm427_vm2, %v169_v10, %v163_v12  ;;  %v172_v21 = vsel %vm431_vm3, %v170_v11, %v164_v27  ;;  %v175_v22 = vstv %s583_s16  ;;  %v176_v23 = vstv %s575_s15 }
  0x37   :  { %v177_v24 = vsel %vm419_vm0, %v175_v22, %v176_v23  ;;  %v178_v33 = vsel %vm423_vm1, %v175_v22, %v176_v23  ;;  %v182_v34 = vstv %s605_s0  ;;  %v190_v37 = vsel %vm423_vm1, %v393_v16, %v390_v14 }
  0x38   :  { %v181_v38 = vstv %s271_s17  ;;  %v191_v39 = vsel %vm419_vm0, %v401_v19, %v397_v17  ;;  %v192_v40 = vsel %vm423_vm1, %v401_v19, %v397_v17  ;;  %v195_v46 = vsel %vm419_vm0, %v403_v20, %v399_v18 }
  0x39   :  { %v183_v47 = vsel %vm419_vm0, %v181_v38, %v182_v34  ;;  %v184_v14 = vsel %vm423_vm1, %v181_v38, %v182_v34  ;;  %v193_v16 = vsel %vm427_vm2, %v191_v39, %v189_v59  ;;  %v194_v50 = vsel %vm431_vm3, %v192_v40, %v190_v37 }
  0x3a   :  { %v185_v17 = vsel %vm427_vm2, %v183_v47, %v177_v24  ;;  %v186_v19 = vsel %vm431_vm3, %v184_v14, %v178_v33  ;;  %v196_v51 = vsel %vm423_vm1, %v403_v20, %v399_v18  ;;  %v198_v52 = vstv %s634_s18 }
  0x3b   :  { %v187_v25 = vsel %vm465_vm4, %v185_v17, %v171_v15  ;;  %v188_v26 = vsel %vm469_vm5, %v186_v19, %v172_v21  ;;  %v199_v55 = vsel %vm419_vm0, %v198_v52, %v484_v45  ;;  %v200_v56 = vsel %vm423_vm1, %v198_v52, %v484_v45 }
  0x3c   :  { %v201_v59 = vsel %vm427_vm2, %v199_v55, %v195_v46  ;;  %v202_v18 = vsel %vm431_vm3, %v200_v56, %v196_v51  ;;  %v205_v20 = vsel %vm587_vm6, %v567_v35, %v97_v57  ;;  %v206_v29 = vsel %vm593_vm7, %v571_v36, %v98_v58 }
  0x3d   :  { %v203_v30 = vsel %vm465_vm4, %v201_v59, %v193_v16  ;;  %v204_v31 = vsel %vm469_vm5, %v202_v18, %v194_v50  ;;  %v207_v32 = vsel %vm587_vm6, %v187_v25, %v157_v4  ;;  %v208_v43 = vsel %vm593_vm7, %v188_v26, %v158_v5 }
  0x3e   :  { %v209_v45 = vsel %vm616_vm8, %v207_v32, %v205_v20  ;;  %v210_v44 = vsel %vm622_vm9, %v208_v43, %v206_v29  ;;  %v211_v41 = vsel %vm587_vm6, %v157_v4, %v567_v35  ;;  %v212_v42 = vsel %vm593_vm7, %v158_v5, %v571_v36 }
  0x3f   :  { %v45_v53 = vsub.f32 %v360_v2, %v43_v8  ;;  %v46_v54 = vsub.f32 %v362_v3, %v44_v9  ;;  %v213_v57 = vsel %vm587_vm6, %v203_v30, %v187_v25  ;;  %v214_v58 = vsel %vm593_vm7, %v204_v31, %v188_v26 }
  0x40   :  { %v215_v35 = vsel %vm616_vm8, %v213_v57, %v211_v41  ;;  %v216_v36 = vsel %vm622_vm9, %v214_v58, %v212_v42 }
  0x41   :  { %v217_v62 = vsub.f32 %v215_v35, %v209_v45  ;;  %v218_v6 = vsub.f32 %v216_v36, %v210_v44 }
  0x43   :  { %v219_v2 = vmul.f32 %v217_v62, %v45_v53  ;;  %v220_v7 = vmul.f32 %v218_v6, %v46_v54 }
  0x45   :  { %v221_v8 = vadd.f32 %v219_v2, %v209_v45  ;;  %v222_v3 = vadd.f32 %v220_v7, %v210_v44 }
  0x47   :  { %223 = vst [vmem:[#allocation7] sm:$0xff] %v221_v8  ;;  %224 = vst [vmem:[#allocation7 + $0x8] sm:$0xff] %v222_v3 }
  0x48   :  { %319 = shalt.err (!%p316_p9)
}
  0x49   :  { %234 = dma.vmem_to_hbm [thread:$0]  %s232_s19, 256, %s761_s2, [#allocation4]  }
  0x4a   :  { %332 = dma.done.wait [#allocation4], 256  }
  0x4b   :  { %333 = vsyncadd [#allocation4], 4294967040 }
  0x4c   :  { %238 = vsyncpa [#allocation3], 1 }
  0x4d   :  { %239 = vsyncpa [#allocation4], 1 }
  0x4e   :  { %240 = vsyncpa [#allocation5], 1 }

</bundles_post_ra>
